<compile_context>
chip_gen: v5e
topology: v5e:2x2
jax: 0.10.0
libtpu: 0.0.40
codegen_flags: <defaults>
</compile_context>

<pallas_src>
import functools
import math

import jax
import jax.numpy as jnp
from jax.experimental import pallas as pl
from jax.experimental.pallas import tpu as pltpu


def _round_up(x, m):
    return ((x + m - 1) // m) * m


def _device_kind():
    try:
        return jax.devices()[0].device_kind.lower()
    except Exception:
        return ""


def _cluster_assign_kernel(x_ref, c_ref, c2_ref, o_ref, *, alpha, power, matmul_dtype):
    x = x_ref[...]        # [TB, D]    f32
    c_dk = c_ref[...]     # [D, Kpad]  f32 (pre-transposed, pre-scaled by 2/alpha)
    c2 = c2_ref[...]      # [1, Kpad]  f32 (||c||^2 / alpha; padded lanes = 1e30)

    # ||x||^2 / alpha per row (VPU/XLU; the 1/alpha multiply is only on a [TB,1] column).
    x2 = jnp.sum(x * x, axis=1, keepdims=True)
    if alpha != 1.0:
        x2 = x2 * (1.0 / alpha)

    # Cross term on the MXU: x @ c_dk with Kpad on the lane axis (no transpose needed).
    if matmul_dtype != jnp.float32:
        xc = jnp.dot(x.astype(matmul_dtype), c_dk.astype(matmul_dtype),
                     preferred_element_type=jnp.float32)
    else:
        xc = jnp.dot(x, c_dk, preferred_element_type=jnp.float32)

    # base = 1 + ||x - c||^2 / alpha  (scales folded into the operands in the wrapper);
    # clamp tiny negatives from cancellation. Padded columns get base ~ 1e30.
    base = 1.0 + jnp.maximum(x2 - xc + c2, 0.0)

    # numerator = base ** (-power); half-integer powers avoid the log+exp pair.
    if power == 1.0:
        numerator = 1.0 / base
    elif power == 0.5:
        numerator = jax.lax.rsqrt(base)
    elif power == 1.5:
        numerator = jax.lax.rsqrt(base) / base
    elif power == 2.0:
        inv = 1.0 / base
        numerator = inv * inv
    else:
        numerator = jnp.exp(-power * jnp.log(base))

    # Padded columns contribute ~0 to the denominator (base ~ 1e30 -> numerator underflows).
    denom = jnp.sum(numerator, axis=1, keepdims=True)     # [TB, 1]
    # Exact divide for the final normalization so rows sum to 1 within float precision.
    o_ref[...] = numerator / denom


def _choose_batch_tile(B, D, Kpad, budget_bytes, cap):
    """Largest batch tile fitting the VMEM budget.

    Accounts for the pipeline double-buffering *everything* (including the constant-index
    centers / ||c||^2 blocks).
    """
    resident = 2 * (D * Kpad + Kpad) * 4          # centers + c2 (double-buffered)
    per_row = 2 * (D + Kpad) * 4                  # x tile + out tile (double-buffered)
    tb = (budget_bytes - resident) // max(per_row, 1)
    tb = int(max(8, min(tb, cap)))
    if tb >= 128:
        tb = (tb // 128) * 128                    # MXU-friendly M
    else:
        tb = (tb // 8) * 8
    return max(tb, 8)


def cluster_assignment(batch, cluster_centers, alpha=1.0, matmul_dtype=jnp.float32):
    """batch: [B, D] f32, cluster_centers: [K, D] f32 -> [B, K] f32 soft assignments."""
    batch = jnp.asarray(batch, jnp.float32)
    centers = jnp.asarray(cluster_centers, jnp.float32)
    B, D = batch.shape
    K, D2 = centers.shape
    assert D == D2
    alpha = float(alpha)
    power = (alpha + 1.0) / 2.0

    # --- Pad clusters to a lane-dense multiple of 128 on the output axis. ------------------
    Kpad = _round_up(max(K, 1), 128)
    scale = 2.0 / alpha
    # Pre-transposed + pre-scaled centers: [D, Kpad], padded columns are zero.
    c_dk = jnp.zeros((D, Kpad), jnp.float32).at[:, :K].set(centers.T * scale)
    # ||c||^2 / alpha row; padded lanes baked to a huge finite value so their numerators
    # underflow to ~0 (replaces the in-kernel iota/where mask).
    c2 = jnp.sum(centers * centers, axis=1) * (1.0 / alpha)                # [K]
    c2_row = jnp.full((1, Kpad), 1e30, jnp.float32).at[0, :K].set(c2)      # [1, Kpad]

    # --- Per-generation VMEM budgeting & batch tiling. --------------------------------------
    kind = _device_kind()
    is_v7 = ("v7" in kind) or ("7x" in kind)
    if is_v7:
        budget, tb_cap, vmem_cap = 14 * 1024 * 1024, 1024, 40 * 1024 * 1024
    else:
        budget, tb_cap, vmem_cap = 32 * 1024 * 1024, 2048, 64 * 1024 * 1024

    TB = _choose_batch_tile(B, D, Kpad, budget, tb_cap)
    # Large batches: force >= 2 grid steps so the "parallel" axis can shard across v7x's 2 TCs.
    if B > 256:
        TB = min(TB, _round_up(pl.cdiv(B, 2), 128))

    row_mult = 16 if matmul_dtype != jnp.float32 else 8   # bf16 sublane packing
    if B <= TB:
        TB = _round_up(B, row_mult)
        Bpad = TB
    else:
        TB = _round_up(TB, row_mult)
        Bpad = _round_up(B, TB)

    if Bpad != B:
        batch_p = jnp.zeros((Bpad, D), jnp.float32).at[:B, :].set(batch)
    else:
        batch_p = batch

    grid = (Bpad // TB,)
    kernel = functools.partial(
        _cluster_assign_kernel,
        alpha=alpha,
        power=power,
        matmul_dtype=matmul_dtype,
    )

    # Double-buffered x/out tiles + double-buffered resident centers/c2, with headroom.
    vmem_need = 2 * TB * (D + Kpad) * 4 + 2 * (D * Kpad + Kpad) * 4
    vmem_limit = int(min(max(int(1.3 * vmem_need), 16 * 1024 * 1024), vmem_cap))

    trans_per_elem = 1 if power in (1.0, 0.5, 1.5, 2.0) else 2
    cost = pl.CostEstimate(
        flops=2 * Bpad * D * Kpad + 5 * Bpad * Kpad,
        transcendentals=trans_per_elem * Bpad * Kpad,
        bytes_accessed=(Bpad * D + Bpad * Kpad + D * Kpad + Kpad) * 4,
    )

    out_p = pl.pallas_call(
        kernel,
        out_shape=jax.ShapeDtypeStruct((Bpad, Kpad), jnp.float32),
        grid=grid,
        in_specs=[
            pl.BlockSpec((TB, D), lambda i: (i, 0)),       # batch tile (pipelined)
            pl.BlockSpec((D, Kpad), lambda i: (0, 0)),     # centers [D, Kpad] (resident)
            pl.BlockSpec((1, Kpad), lambda i: (0, 0)),     # ||c||^2/alpha (resident)
        ],
        out_specs=pl.BlockSpec((TB, Kpad), lambda i: (i, 0)),
        compiler_params=pltpu.CompilerParams(
            dimension_semantics=("parallel",),
            vmem_limit_bytes=vmem_limit,
        ),
        cost_estimate=cost,
    )(batch_p, c_dk, c2_row)

    return out_p[:B, :K]


def xavier_uniform_centers(key, cluster_number, embedding_dimension):
    # Matches torch.nn.init.xavier_uniform_ on a [K, D] tensor:
    # bound = sqrt(6 / (fan_in + fan_out)) = sqrt(6 / (D + K))
    bound = math.sqrt(6.0 / (embedding_dimension + cluster_number))
    return jax.random.uniform(
        key,
        (cluster_number, embedding_dimension),
        dtype=jnp.float32,
        minval=-bound,
        maxval=bound,
    )


def reference(batch, centers, alpha=1.0):
    # Pure-JAX reference mirroring the PyTorch forward exactly.
    diff = batch[:, None, :] - centers[None, :, :]
    norm_squared = jnp.sum(diff * diff, axis=2)
    numerator = 1.0 / (1.0 + norm_squared / alpha)
    power = (alpha + 1.0) / 2.0
    numerator = numerator ** power
    return numerator / jnp.sum(numerator, axis=1, keepdims=True)


if __name__ == "__main__":
    key = jax.random.PRNGKey(0)
    k_batch, k_centers = jax.random.split(key)

    B = 16                # batch size
    D = 32                # embedding dimension
    K = 4                 # cluster number

    batch = jax.random.normal(k_batch, (B, D), dtype=jnp.float32)
    centers = xavier_uniform_centers(k_centers, K, D)

    # alpha = 1 (power == 1: plain reciprocal path)
    out = cluster_assignment(batch, centers, alpha=1.0)
    out = jax.block_until_ready(out)
    ref = reference(batch, centers, alpha=1.0)
    assert out.shape == (B, K)
    assert jnp.allclose(out, ref, atol=2e-3, rtol=2e-3), (out, ref)
    assert jnp.allclose(jnp.sum(out, axis=1), 1.0, atol=1e-3)

    # alpha = 2 (power == 1.5: rsqrt * reciprocal path)
    out2 = cluster_assignment(batch, centers, alpha=2.0)
    out2 = jax.block_until_ready(out2)
    ref2 = reference(batch, centers, alpha=2.0)
    assert jnp.allclose(out2, ref2, atol=2e-3, rtol=2e-3), (out2, ref2)
    assert jnp.allclose(jnp.sum(out2, axis=1), 1.0, atol=1e-3)

    print("KERNEL_OK")
</pallas_src>

<mosaic_0001>
module attributes {stable_mosaic.version = 11 : i64} {
  func.func @_cluster_assign_kernel(%arg0: i32, %arg1: memref<16x32xf32, #tpu.memory_space<vmem>>, %arg2: memref<32x128xf32, #tpu.memory_space<vmem>>, %arg3: memref<1x128xf32, #tpu.memory_space<vmem>>, %arg4: memref<16x128xf32, #tpu.memory_space<vmem>>) attributes {dimension_semantics = [#tpu.dimension_semantics<parallel>], iteration_bounds = array<i64: 1>, scalar_prefetch = 0 : i64, scratch_operands = 0 : i64, tpu.core_type = #tpu.core_type<tc>, window_params = [{transform_indices = @transform_0, window_bounds = array<i64: 16, 32>}, {pipeline_mode = #tpu.pipeline_mode<synchronous>, transform_indices = @transform_1, window_bounds = array<i64: 32, 128>}, {pipeline_mode = #tpu.pipeline_mode<synchronous>, transform_indices = @transform_2, window_bounds = array<i64: 1, 128>}, {transform_indices = @transform_3, window_bounds = array<i64: 16, 128>}]} {
    %c0 = arith.constant 0 : index
    %c0_0 = arith.constant 0 : index
    %0 = vector.load %arg1[%c0, %c0_0] : memref<16x32xf32, #tpu.memory_space<vmem>>, vector<16x32xf32>
    %c0_1 = arith.constant 0 : index
    %c0_2 = arith.constant 0 : index
    %1 = vector.load %arg2[%c0_1, %c0_2] : memref<32x128xf32, #tpu.memory_space<vmem>>, vector<32x128xf32>
    %c0_3 = arith.constant 0 : index
    %c0_4 = arith.constant 0 : index
    %2 = vector.load %arg3[%c0_3, %c0_4] : memref<1x128xf32, #tpu.memory_space<vmem>>, vector<1x128xf32>
    %3 = arith.mulf %0, %0 : vector<16x32xf32>
    %cst = arith.constant dense<0.000000e+00> : vector<16xf32>
    %4 = vector.multi_reduction <add>, %3, %cst [1] : vector<16x32xf32> to vector<16xf32>
    %5 = vector.shape_cast %4 : vector<16xf32> to vector<16x1xf32>
    %cst_5 = arith.constant dense<0.000000e+00> : vector<16x128xf32>
    %6 = tpu.matmul %0, %1, %cst_5 {dimension_numbers = #tpu.dot_dimension_numbers<[1], [0], [0], [1], [0, 0, 1, 1], [], []>} : vector<16x32xf32>, vector<32x128xf32>, vector<16x128xf32> -> vector<16x128xf32>
    %7 = vector.broadcast %5 : vector<16x1xf32> to vector<16x128xf32>
    %8 = arith.subf %7, %6 : vector<16x128xf32>
    %9 = vector.broadcast %2 : vector<1x128xf32> to vector<16x128xf32>
    %10 = arith.addf %8, %9 : vector<16x128xf32>
    %cst_6 = arith.constant 0.000000e+00 : f32
    %11 = vector.broadcast %cst_6 : f32 to vector<16x128xf32>
    %12 = arith.maximumf %10, %11 : vector<16x128xf32>
    %cst_7 = arith.constant 1.000000e+00 : f32
    %13 = vector.broadcast %cst_7 : f32 to vector<16x128xf32>
    %14 = arith.addf %13, %12 : vector<16x128xf32>
    %cst_8 = arith.constant 1.000000e+00 : f32
    %15 = vector.broadcast %cst_8 : f32 to vector<16x128xf32>
    %16 = arith.divf %15, %14 : vector<16x128xf32>
    %cst_9 = arith.constant dense<0.000000e+00> : vector<16xf32>
    %17 = vector.multi_reduction <add>, %16, %cst_9 [1] : vector<16x128xf32> to vector<16xf32>
    %18 = vector.shape_cast %17 : vector<16xf32> to vector<16x1xf32>
    %19 = vector.broadcast %18 : vector<16x1xf32> to vector<16x128xf32>
    %20 = arith.divf %16, %19 : vector<16x128xf32>
    %c0_10 = arith.constant 0 : index
    %c0_11 = arith.constant 0 : index
    %21 = vector.load %arg4[%c0_10, %c0_11] : memref<16x128xf32, #tpu.memory_space<vmem>>, vector<16x128xf32>
    tpu.vector_store %arg4[%c0_10, %c0_11], %20 {strides = array<i32>} : memref<16x128xf32, #tpu.memory_space<vmem>>, vector<16x128xf32>,
    return
  }
  func.func @transform_0(%arg0: i32) -> (i32, i32) {
    %c0_i32 = arith.constant 0 : i32
    %c0_i32_0 = arith.constant 0 : i32
    return %arg0, %c0_i32 : i32, i32
  }
  func.func @transform_1(%arg0: i32) -> (i32, i32) {
    %c0_i32 = arith.constant 0 : i32
    %c0_i32_0 = arith.constant 0 : i32
    %c0_i32_1 = arith.constant 0 : i32
    return %c0_i32, %c0_i32_0 : i32, i32
  }
  func.func @transform_2(%arg0: i32) -> (i32, i32) {
    %c0_i32 = arith.constant 0 : i32
    %c0_i32_0 = arith.constant 0 : i32
    %c0_i32_1 = arith.constant 0 : i32
    return %c0_i32, %c0_i32_0 : i32, i32
  }
  func.func @transform_3(%arg0: i32) -> (i32, i32) {
    %c0_i32 = arith.constant 0 : i32
    %c0_i32_0 = arith.constant 0 : i32
    return %arg0, %c0_i32 : i32, i32
  }
}

</mosaic_0001>

<bundles_post_ra>
// kernel: tpu_custom_call.1
= control target key start
LH: loop header
LB: loop body
LE: loop exit
PB: predicated region body
PF: predicated region fallthrough
CT: control target
= control target key end

     0   :  { %8 = vsyncpa [#allocation3], 0  ;;  %s337_s0 = inlined_call_operand.hbm [shape: f32[16,32], index: 0, kind: input, shape index: {}]   ;;  %s338_s1 = inlined_call_operand.hbm [shape: f32[32,128], index: 1, kind: input, shape index: {}]   ;;  %s339_s2 = inlined_call_operand.vmem [shape: f32[1,128], index: 2, kind: input, shape index: {}]   ;;  %s340_s3 = inlined_call_operand.hbm [shape: f32[16,128], index: 3, kind: output, shape index: {}]  }
   0x1   :  { %9 = vsyncpa [#allocation6], 0 }
   0x2   :  { %10 = vsyncpa [#allocation4], 0  ;;  %s15_s14 = sshll.u32 %s337_s0, 4  ;;  %s287_s15 = smov [#allocation2]   ;;  %s16_s14 = int_to_ptr.hbm [resolvable:$true] %s15_s14 }
   0x3   :  { %s17_s16 = sshll.u32 %s287_s15, 4  ;;  %s28_s19 = sshll.u32 %s338_s1, 4  ;;  %s18_s16 = int_to_ptr.vmem [resolvable:$true] %s17_s16  ;;  %s29_s19 = int_to_ptr.hbm [resolvable:$true] %s28_s19 }
   0x4   :  { %s288_s20 = smov 128   ;;  %s289_s21 = smov 8  }
   0x5   :  { %23 = dma.hbm_to_vmem [thread:$0]  %s16_s14, 256, %s18_s16, [#allocation3], %s288_s20, %s288_s20, %s289_s21  }
   0x6   :  { %s290_s22 = smov [#allocation5]  }
   0x7   :  { %s30_s23 = sshll.u32 %s290_s22, 4  ;;  %s31_s23 = int_to_ptr.vmem [resolvable:$true] %s30_s23 }
   0x8   :  { %36 = dma.hbm_to_vmem [thread:$0]  %s29_s19, 512, %s31_s23, [#allocation6], %s288_s20, %s288_s20, %s289_s21  }
   0x9   :  { %281 = dma.done.wait [#allocation3], 256  }
   0xa   :  { %282 = vsyncadd [#allocation3], 4294967040 }
   0xb   :  { %283 = dma.done.wait [#allocation6], 512  }
   0xc   :  { %284 = vsyncadd [#allocation6], 4294966784  ;;  %v52_v0 = vld [vmem:[#allocation5 + $0x18] sm:$0xff]  ;;  %v51_v1 = vld [vmem:[#allocation5 + $0x10] sm:$0xff]  ;;  %vm56_vm0 = vcmask 261120   ;;  %s175_s27 = sshll.u32 %s340_s3, 4  ;;  %s176_s27 = int_to_ptr.hbm [resolvable:$true] %s175_s27 }
   0xd   :  { %81 = vmatpush.msra.mxu0 %v52_v0  ;;  %191 = vmatpush.msra.mxu1 %v52_v0  ;;  %v47_v2 = vld [vmem:[#allocation2] sm:$0xff]  ;;  %v50_v3 = vld [vmem:[#allocation5 + $0x8] sm:$0xff]  ;;  %v49_v5 = vld [vmem:[#allocation5] sm:$0xff] }
   0xe   :  { %v54_v4 = vmul.f32 %v47_v2, %v47_v2  ;;  %v48_v7 = vld [vmem:[#allocation2 + $0x8] sm:$0xff]  ;;  %v200_v12 = vld [vmem:[%s339_s2] ss:$0 sm:$0xff]  ;;  %s291_s2 = smov [#allocation7]  }
   0xf   :  { %82 = vmatpush.msra.mxu0 %v51_v1  ;;  %192 = vmatpush.msra.mxu1 %v51_v1  ;;  %v55_v8 = vmul.f32 %v48_v7, %v48_v7  ;;  %s173_s24 = sshll.u32 %s291_s2, 4  ;;  %s174_s24 = int_to_ptr.vmem [resolvable:$true] %s173_s24 }
  0x10   :  { %v57_v6 = vsel %vm56_vm0, %v54_v4, 0.0 }
  0x11   :  { %83 = vmatpush.msra.mxu0 %v50_v3  ;;  %193 = vmatpush.msra.mxu1 %v50_v3  ;;  %v60_v9 = vsel %vm56_vm0, %v55_v8, 0.0 }
  0x12   :  { %58 = vadd.xlane.f32.xlu0 %v57_v6 }
  0x13   :  { %84 = vmatpush.msra.mxu0 %v49_v5  ;;  %194 = vmatpush.msra.mxu1 %v49_v5 }
  0x14   :  { %189 = vmatmul.msk.f32.vlgmr.msra.gmra.mxu0 %vm56_vm0, %v47_v2  ;;  %190 = vmatmul.msk.f32.vlgmr.msra.gmra.mxu1 %vm56_vm0, %v48_v7 }
  0x1a   :  { %61 = vadd.xlane.f32.xlu0 %v60_v9 }
  0x85   :  { %v59_v10 = vpop.xlane.xlu0 %58 }
  0x8d   :  { %v62_v11 = vpop.xlane.xlu0 %61 }
  0x91   :  { %v86_v13 = vpop.f32.mrf.mxu0  ;;  %v89_v14 = vpop.f32.mrf.mxu1 }
  0x92   :  { %v92_v15 = vsub.f32 %v59_v10, %v86_v13  ;;  %v93_v16 = vsub.f32 %v62_v11, %v89_v14 }
  0x94   :  { %v97_v17 = vadd.f32 %v200_v12, %v92_v15  ;;  %v98_v18 = vadd.f32 %v200_v12, %v93_v16 }
  0x96   :  { %v99_v19 = vmax.f32 %v97_v17, 0.0  ;;  %v100_v20 = vmax.f32 %v98_v18, 0.0 }
  0x98   :  { %v101_v21 = vadd.f32 1.0, %v99_v19  ;;  %v102_v22 = vadd.f32 1.0, %v100_v20 }
  0x9a   :  { %201 = vrcp.f32 %v101_v21  ;;  %v114_v28 = vand.u32 2147483648, %v101_v21  ;;  %v112_v31 = vand.u32 2147483647, %v101_v21  ;;  %vm108_vm2 = vweird.f32 %v101_v21 }
  0x9b   :  { %203 = vrcp.f32 %v102_v22  ;;  %vm123_vm5 = vweird.f32 %v102_v22  ;;  %v129_v38 = vand.u32 2147483648, %v102_v22  ;;  %v127_v39 = vand.u32 2147483647, %v102_v22 }
  0x9c   :  { %v115_v34 = vor.u32 1.1754944e-38, %v114_v28  ;;  %vm113_vm4 = vcmp.eq.f32.partialorder %v112_v31, 8.507059e+37 }
  0x9d   :  { %v130_v41 = vor.u32 1.1754944e-38, %v129_v38  ;;  %vm128_vm8 = vcmp.eq.f32.partialorder %v127_v39, 8.507059e+37 }
  0xa0   :  { %v202_v23 = vpop.eup %201 }
  0xa1   :  { %v204_v24 = vpop.eup %203  ;;  %v104_v25 = vmul.f32 %v202_v23, %v101_v21  ;;  %vm109_vm1 = vweird.f32 %v202_v23 }
  0xa2   :  { %v119_v26 = vmul.f32 %v204_v24, %v102_v22  ;;  %vm110_vm3 = vmor %vm108_vm2, %vm109_vm1  ;;  %vm124_vm6 = vweird.f32 %v204_v24 }
  0xa3   :  { %v105_v27 = vsub.f32 1.0, %v104_v25  ;;  %vm125_vm7 = vmor %vm123_vm5, %vm124_vm6 }
  0xa4   :  { %v120_v29 = vsub.f32 1.0, %v119_v26 }
  0xa5   :  { %v106_v30 = vmul.f32 %v202_v23, %v105_v27 }
  0xa6   :  { %v121_v33 = vmul.f32 %v204_v24, %v120_v29 }
  0xa7   :  { %v107_v32 = vadd.f32 %v202_v23, %v106_v30 }
  0xa8   :  { %v122_v37 = vadd.f32 %v204_v24, %v121_v33 }
  0xa9   :  { %v111_v35 = vsel %vm110_vm3, %v202_v23, %v107_v32 }
  0xaa   :  { %v116_v36 = vsel %vm113_vm4, %v115_v34, %v111_v35  ;;  %v126_v40 = vsel %vm125_vm7, %v204_v24, %v122_v37 }
  0xab   :  { %133 = vadd.xlane.f32.xlu1 %v116_v36  ;;  %v131_v42 = vsel %vm128_vm8, %v130_v41, %v126_v40 }
  0xb3   :  { %135 = vadd.xlane.f32.xlu1 %v131_v42 }
 0x11e   :  { %v134_v43 = vpop.xlane.xlu1 %133 }
 0x11f   :  { %205 = vrcp.f32 %v134_v43  ;;  %v148_v48 = vand.u32 2147483648, %v134_v43  ;;  %v146_v50 = vand.u32 2147483647, %v134_v43  ;;  %vm142_vm10 = vweird.f32 %v134_v43 }
 0x121   :  { %v149_v53 = vor.u32 1.1754944e-38, %v148_v48  ;;  %vm147_vm12 = vcmp.eq.f32.partialorder %v146_v50, 8.507059e+37 }
 0x125   :  { %v206_v44 = vpop.eup %205 }
 0x126   :  { %v138_v45 = vmul.f32 %v206_v44, %v134_v43  ;;  %v136_v46 = vpop.xlane.xlu1 %135  ;;  %vm143_vm9 = vweird.f32 %v206_v44 }
 0x127   :  { %207 = vrcp.f32 %v136_v46  ;;  %vm144_vm11 = vmor %vm142_vm10, %vm143_vm9  ;;  %v163_v59 = vand.u32 2147483648, %v136_v46  ;;  %v161_v61 = vand.u32 2147483647, %v136_v46  ;;  %vm157_vm14 = vweird.f32 %v136_v46 }
 0x128   :  { %v139_v47 = vsub.f32 1.0, %v138_v45 }
 0x129   :  { %v164_v63 = vor.u32 1.1754944e-38, %v163_v59  ;;  %vm162_vm0 = vcmp.eq.f32.partialorder %v161_v61, 8.507059e+37 }
 0x12a   :  { %v140_v49 = vmul.f32 %v206_v44, %v139_v47 }
 0x12c   :  { %v141_v51 = vadd.f32 %v206_v44, %v140_v49 }
 0x12d   :  { %v208_v52 = vpop.eup %207 }
 0x12e   :  { %v153_v54 = vmul.f32 %v208_v52, %v136_v46  ;;  %v145_v55 = vsel %vm144_vm11, %v206_v44, %v141_v51  ;;  %vm158_vm13 = vweird.f32 %v208_v52 }
 0x12f   :  { %v150_v56 = vsel %vm147_vm12, %v149_v53, %v145_v55  ;;  %vm159_vm15 = vmor %vm157_vm14, %vm158_vm13 }
 0x130   :  { %v154_v57 = vsub.f32 1.0, %v153_v54  ;;  %v151_v58 = vmul.f32 %v150_v56, %v116_v36 }
 0x132   :  { %v155_v60 = vmul.f32 %v208_v52, %v154_v57  ;;  %167 = vst [vmem:[#allocation7] sm:$0xff] %v151_v58 }
 0x134   :  { %v156_v62 = vadd.f32 %v208_v52, %v155_v60 }
 0x136   :  { %v160_v0 = vsel %vm159_vm15, %v208_v52, %v156_v62 }
 0x137   :  { %v165_v1 = vsel %vm162_vm0, %v164_v63, %v160_v0 }
 0x138   :  { %v166_v2 = vmul.f32 %v165_v1, %v131_v42 }
 0x13a   :  { %168 = vst [vmem:[#allocation7 + $0x8] sm:$0xff] %v166_v2 }
 0x13b   :  { %181 = dma.vmem_to_hbm [thread:$0]  %s174_s24, 256, %s176_s27, [#allocation4], %s288_s20, %s288_s20, %s289_s21  }
 0x13c   :  { %285 = dma.done.wait [#allocation4], 256  }
 0x13d   :  { %286 = vsyncadd [#allocation4], 4294967040 }
 0x13e   :  { %186 = vsyncpa [#allocation3], 1 }
 0x13f   :  { %187 = vsyncpa [#allocation6], 1 }
 0x140   :  { %188 = vsyncpa [#allocation4], 1 }

</bundles_post_ra>
